<compile_context>
chip_gen: v6e
topology: v6e:2x2x1
jax: 0.10.0
libtpu: 0.0.40
codegen_flags: <defaults>
</compile_context>

<pallas_src>
import functools

import jax
import jax.numpy as jnp
from jax.experimental import pallas as pl
from jax.experimental.pallas import tpu as pltpu


def mha_kernel(x_ref, wqkv_ref, bqkv_ref, o_ref, *, d_head: int):
    # x_ref:    (1, H, S, D)   input dtype (f32)
    # wqkv_ref: (H, D, 3D)     bf16, fused [Wq.T | Wk.T | Wv.T] per head
    # bqkv_ref: (H, 1, 3D)     f32, fused [bq | bk | bv] per head
    # o_ref:    (1, H, S, D)
    xh = x_ref[0].astype(jnp.bfloat16)                     # (H, S, D)
    w = wqkv_ref[...]                                      # (H, D, 3D) bf16

    # Fused per-head Q/K/V projection: one head-batched MXU pass, f32 accumulate.
    qkv = jnp.einsum('hsd,hdf->hsf', xh, w,
                     preferred_element_type=jnp.float32) + bqkv_ref[...]   # (H, S, 3D)

    q = qkv[:, :, 0 * d_head:1 * d_head]                   # (H, S, D)
    k = qkv[:, :, 1 * d_head:2 * d_head]
    v = qkv[:, :, 2 * d_head:3 * d_head]

    # Attention scores (head-batched), scaled by 1/sqrt(d_head).
    scale = 1.0 / (d_head ** 0.5)
    s = jnp.einsum('hqd,hkd->hqk',
                   q.astype(jnp.bfloat16), k.astype(jnp.bfloat16),
                   preferred_element_type=jnp.float32) * scale             # (H, S, S)

    # Numerically-stable softmax; divide via EUP approximate reciprocal.
    s = s - jnp.max(s, axis=-1, keepdims=True)
    p = jnp.exp(s)
    denom = jnp.sum(p, axis=-1, keepdims=True)
    p = p * pl.reciprocal(denom, approx=True)

    out = jnp.einsum('hqk,hkd->hqd',
                     p.astype(jnp.bfloat16), v.astype(jnp.bfloat16),
                     preferred_element_type=jnp.float32)                   # (H, S, D)
    o_ref[0] = out.astype(o_ref.dtype)


def multi_head_attention(x, w_qkv, b_qkv, *, n_heads: int):
    """x: (B, S, d_model) f32; w_qkv: (H, D, 3D) bf16; b_qkv: (H, 1, 3D) f32."""
    B, S, E = x.shape
    assert E % n_heads == 0
    d_head = E // n_heads
    H = n_heads

    # Split heads wrapper-side (cheap XLA layout plumbing): (B, H, S, D).
    xh = x.reshape(B, S, H, d_head).transpose(0, 2, 1, 3)

    kernel = functools.partial(mha_kernel, d_head=d_head)

    out_h = pl.pallas_call(
        kernel,
        out_shape=jax.ShapeDtypeStruct((B, H, S, d_head), x.dtype),
        grid=(B,),
        in_specs=[
            pl.BlockSpec((1, H, S, d_head), lambda b: (b, 0, 0, 0)),       # x (per batch)
            pl.BlockSpec((H, d_head, 3 * d_head), lambda b: (0, 0, 0)),    # fused W_qkv
            pl.BlockSpec((H, 1, 3 * d_head), lambda b: (0, 0, 0)),         # fused b_qkv
        ],
        out_specs=pl.BlockSpec((1, H, S, d_head), lambda b: (b, 0, 0, 0)),
        compiler_params=pltpu.CompilerParams(
            dimension_semantics=("parallel",),
            vmem_limit_bytes=64 * 1024 * 1024,
        ),
    )(xh, w_qkv, b_qkv)

    # Merge heads back to (B, S, d_model).
    return out_h.transpose(0, 2, 1, 3).reshape(B, S, E)


# ----------------------------- parameters ----------------------------------


def init_params(key, d_model: int, n_heads: int):
    """Per-head Linear params in PyTorch orientation: W (out, in), b (out,)."""
    d_head = d_model // n_heads
    bound = 1.0 / (d_head ** 0.5)
    ks = jax.random.split(key, 6)
    shp_w = (n_heads, d_head, d_head)
    shp_b = (n_heads, d_head)
    return {
        "wq": jax.random.uniform(ks[0], shp_w, jnp.float32, -bound, bound),
        "wk": jax.random.uniform(ks[1], shp_w, jnp.float32, -bound, bound),
        "wv": jax.random.uniform(ks[2], shp_w, jnp.float32, -bound, bound),
        "bq": jax.random.uniform(ks[3], shp_b, jnp.float32, -bound, bound),
        "bk": jax.random.uniform(ks[4], shp_b, jnp.float32, -bound, bound),
        "bv": jax.random.uniform(ks[5], shp_b, jnp.float32, -bound, bound),
    }


def fuse_qkv_params(params):
    """Fuse per-head Q/K/V Linears into (H, D, 3D) bf16 weight + (H, 1, 3D) f32 bias."""
    to_in_out = lambda w: jnp.swapaxes(w, 1, 2)            # (H, out, in) -> (H, in, out)
    w_qkv = jnp.concatenate(
        [to_in_out(params["wq"]), to_in_out(params["wk"]), to_in_out(params["wv"])],
        axis=-1).astype(jnp.bfloat16)                       # (H, D, 3D)
    b_qkv = jnp.concatenate(
        [params["bq"], params["bk"], params["bv"]], axis=-1)[:, None, :]   # (H, 1, 3D)
    return w_qkv, b_qkv.astype(jnp.float32)


# ----------------------------- reference ------------------------------------


def mha_reference(x, params, n_heads: int):
    B, S, E = x.shape
    d_head = E // n_heads
    xh = x.reshape(B, S, n_heads, d_head).transpose(0, 2, 1, 3)            # (B,H,S,D)
    q = jnp.einsum('bhsd,hod->bhso', xh, params["wq"]) + params["bq"][None, :, None, :]
    k = jnp.einsum('bhsd,hod->bhso', xh, params["wk"]) + params["bk"][None, :, None, :]
    v = jnp.einsum('bhsd,hod->bhso', xh, params["wv"]) + params["bv"][None, :, None, :]
    s = jnp.einsum('bhqd,bhkd->bhqk', q, k) / (d_head ** 0.5)
    p = jax.nn.softmax(s, axis=-1)
    o = jnp.einsum('bhqk,bhkd->bhqd', p, v)
    return o.transpose(0, 2, 1, 3).reshape(B, S, E)


# ------------------------------- main ----------------------------------------


if __name__ == "__main__":
    B, S, d_model, n_heads = 2, 8, 32, 4
    key = jax.random.PRNGKey(0)
    kx, kp = jax.random.split(key)
    x = jax.random.normal(kx, (B, S, d_model), jnp.float32)
    params = init_params(kp, d_model, n_heads)
    w_qkv, b_qkv = fuse_qkv_params(params)

    out = multi_head_attention(x, w_qkv, b_qkv, n_heads=n_heads)
    jax.block_until_ready(out)
    assert out.shape == (B, S, d_model)

    # Tolerance check vs the fp32 pure-JAX reference (kernel uses bf16 matmuls
    # with f32 accumulation + approx reciprocal, so allow small drift).
    ref = mha_reference(x, params, n_heads)
    max_err = float(jnp.max(jnp.abs(out - ref)))
    assert max_err < 5e-2, f"max abs error too large: {max_err}"

    print("KERNEL_OK")
</pallas_src>

<mosaic_0001>
module attributes {stable_mosaic.version = 11 : i64} {
  func.func @mha_kernel(%arg0: i32, %arg1: memref<1x4x8x8xf32, #tpu.memory_space<vmem>>, %arg2: memref<4x8x24xbf16, #tpu.memory_space<vmem>>, %arg3: memref<4x1x24xf32, #tpu.memory_space<vmem>>, %arg4: memref<1x4x8x8xf32, #tpu.memory_space<vmem>>) attributes {dimension_semantics = [#tpu.dimension_semantics<parallel>], iteration_bounds = array<i64: 2>, scalar_prefetch = 0 : i64, scratch_operands = 0 : i64, tpu.core_type = #tpu.core_type<tc>, window_params = [{transform_indices = @transform_0, window_bounds = array<i64: 1, 4, 8, 8>}, {pipeline_mode = #tpu.pipeline_mode<synchronous>, transform_indices = @transform_1, window_bounds = array<i64: 4, 8, 24>}, {pipeline_mode = #tpu.pipeline_mode<synchronous>, transform_indices = @transform_2, window_bounds = array<i64: 4, 1, 24>}, {transform_indices = @transform_3, window_bounds = array<i64: 1, 4, 8, 8>}]} {
    %c0 = arith.constant 0 : index
    %c0_0 = arith.constant 0 : index
    %c0_1 = arith.constant 0 : index
    %c0_2 = arith.constant 0 : index
    %0 = vector.load %arg1[%c0, %c0_0, %c0_1, %c0_2] : memref<1x4x8x8xf32, #tpu.memory_space<vmem>>, vector<1x4x8x8xf32>
    %1 = vector.shape_cast %0 : vector<1x4x8x8xf32> to vector<4x8x8xf32>
    %2 = arith.truncf %1 : vector<4x8x8xf32> to vector<4x8x8xbf16>
    %c0_3 = arith.constant 0 : index
    %c0_4 = arith.constant 0 : index
    %c0_5 = arith.constant 0 : index
    %3 = vector.load %arg2[%c0_3, %c0_4, %c0_5] : memref<4x8x24xbf16, #tpu.memory_space<vmem>>, vector<4x8x24xbf16>
    "tpu.trace_start"() <{level = 10 : i32, message = "hsd,hdf->hsf"}> : () -> ()
    %cst = arith.constant dense<0.000000e+00> : vector<4x8x24xf32>
    %4 = tpu.matmul %2, %3, %cst {dimension_numbers = #tpu.dot_dimension_numbers<[2], [1], [1], [2], [0, 0, 0, 1, 1, 2], [0], [0]>} : vector<4x8x8xbf16>, vector<4x8x24xbf16>, vector<4x8x24xf32> -> vector<4x8x24xf32>
    "tpu.trace_stop"() : () -> ()
    %c0_6 = arith.constant 0 : index
    %c0_7 = arith.constant 0 : index
    %c0_8 = arith.constant 0 : index
    %5 = vector.load %arg3[%c0_6, %c0_7, %c0_8] : memref<4x1x24xf32, #tpu.memory_space<vmem>>, vector<4x1x24xf32>
    %6 = vector.broadcast %5 : vector<4x1x24xf32> to vector<4x8x24xf32>
    %7 = arith.addf %4, %6 : vector<4x8x24xf32>
    %8 = vector.extract_strided_slice %7 {offsets = [0, 0, 0], sizes = [4, 8, 8], strides = [1, 1, 1]} : vector<4x8x24xf32> to vector<4x8x8xf32>
    %9 = vector.extract_strided_slice %7 {offsets = [0, 0, 8], sizes = [4, 8, 8], strides = [1, 1, 1]} : vector<4x8x24xf32> to vector<4x8x8xf32>
    %10 = vector.extract_strided_slice %7 {offsets = [0, 0, 16], sizes = [4, 8, 8], strides = [1, 1, 1]} : vector<4x8x24xf32> to vector<4x8x8xf32>
    %11 = arith.truncf %8 : vector<4x8x8xf32> to vector<4x8x8xbf16>
    %12 = arith.truncf %9 : vector<4x8x8xf32> to vector<4x8x8xbf16>
    "tpu.trace_start"() <{level = 10 : i32, message = "hqd,hkd->hqk"}> : () -> ()
    %cst_9 = arith.constant dense<0.000000e+00> : vector<4x8x8xf32>
    %13 = tpu.matmul %11, %12, %cst_9 {dimension_numbers = #tpu.dot_dimension_numbers<[2], [2], [1], [1], [0, 0, 0, 1, 1, 1], [0], [0]>} : vector<4x8x8xbf16>, vector<4x8x8xbf16>, vector<4x8x8xf32> -> vector<4x8x8xf32>
    "tpu.trace_stop"() : () -> ()
    %cst_10 = arith.constant 0.353553385 : f32
    %14 = vector.broadcast %cst_10 : f32 to vector<4x8x8xf32>
    %15 = arith.mulf %13, %14 : vector<4x8x8xf32>
    %cst_11 = arith.constant dense<0xFF800000> : vector<4x8xf32>
    %16 = vector.multi_reduction <maximumf>, %15, %cst_11 [2] : vector<4x8x8xf32> to vector<4x8xf32>
    %17 = vector.shape_cast %16 : vector<4x8xf32> to vector<4x8x1xf32>
    %18 = vector.broadcast %17 : vector<4x8x1xf32> to vector<4x8x8xf32>
    %19 = arith.subf %15, %18 : vector<4x8x8xf32>
    %20 = math.exp %19 : vector<4x8x8xf32>
    %cst_12 = arith.constant dense<0.000000e+00> : vector<4x8xf32>
    %21 = vector.multi_reduction <add>, %20, %cst_12 [2] : vector<4x8x8xf32> to vector<4x8xf32>
    %22 = vector.shape_cast %21 : vector<4x8xf32> to vector<4x8x1xf32>
    %23 = tpu.reciprocal %22 {approx = true} : vector<4x8x1xf32> -> vector<4x8x1xf32>
    %24 = vector.broadcast %23 : vector<4x8x1xf32> to vector<4x8x8xf32>
    %25 = arith.mulf %20, %24 : vector<4x8x8xf32>
    %26 = arith.truncf %25 : vector<4x8x8xf32> to vector<4x8x8xbf16>
    %27 = arith.truncf %10 : vector<4x8x8xf32> to vector<4x8x8xbf16>
    "tpu.trace_start"() <{level = 10 : i32, message = "hqk,hkd->hqd"}> : () -> ()
    %cst_13 = arith.constant dense<0.000000e+00> : vector<4x8x8xf32>
    %28 = tpu.matmul %26, %27, %cst_13 {dimension_numbers = #tpu.dot_dimension_numbers<[2], [1], [1], [2], [0, 0, 0, 1, 1, 2], [0], [0]>} : vector<4x8x8xbf16>, vector<4x8x8xbf16>, vector<4x8x8xf32> -> vector<4x8x8xf32>
    "tpu.trace_stop"() : () -> ()
    %c0_14 = arith.constant 0 : index
    %c0_15 = arith.constant 0 : index
    %c0_16 = arith.constant 0 : index
    %c0_17 = arith.constant 0 : index
    %29 = vector.load %arg4[%c0_14, %c0_15, %c0_16, %c0_17] : memref<1x4x8x8xf32, #tpu.memory_space<vmem>>, vector<1x4x8x8xf32>
    %30 = vector.shape_cast %29 : vector<1x4x8x8xf32> to vector<4x8x8xf32>
    %31 = vector.shape_cast %28 : vector<4x8x8xf32> to vector<1x4x8x8xf32>
    tpu.vector_store %arg4[%c0_14, %c0_15, %c0_16, %c0_17], %31 {strides = array<i32>} : memref<1x4x8x8xf32, #tpu.memory_space<vmem>>, vector<1x4x8x8xf32>,
    return
  }
  func.func @transform_0(%arg0: i32) -> (i32, i32, i32, i32) {
    %c0_i32 = arith.constant 0 : i32
    %c0_i32_0 = arith.constant 0 : i32
    %c0_i32_1 = arith.constant 0 : i32
    %c0_i32_2 = arith.constant 0 : i32
    return %arg0, %c0_i32, %c0_i32_0, %c0_i32_1 : i32, i32, i32, i32
  }
  func.func @transform_1(%arg0: i32) -> (i32, i32, i32) {
    %c0_i32 = arith.constant 0 : i32
    %c0_i32_0 = arith.constant 0 : i32
    %c0_i32_1 = arith.constant 0 : i32
    %c0_i32_2 = arith.constant 0 : i32
    return %c0_i32, %c0_i32_0, %c0_i32_1 : i32, i32, i32
  }
  func.func @transform_2(%arg0: i32) -> (i32, i32, i32) {
    %c0_i32 = arith.constant 0 : i32
    %c0_i32_0 = arith.constant 0 : i32
    %c0_i32_1 = arith.constant 0 : i32
    %c0_i32_2 = arith.constant 0 : i32
    return %c0_i32, %c0_i32_0, %c0_i32_1 : i32, i32, i32
  }
  func.func @transform_3(%arg0: i32) -> (i32, i32, i32, i32) {
    %c0_i32 = arith.constant 0 : i32
    %c0_i32_0 = arith.constant 0 : i32
    %c0_i32_1 = arith.constant 0 : i32
    %c0_i32_2 = arith.constant 0 : i32
    return %arg0, %c0_i32, %c0_i32_0, %c0_i32_1 : i32, i32, i32, i32
  }
}

</mosaic_0001>

<bundles_post_ra>
// kernel: tpu_custom_call.1
= control target key start
LH: loop header
LB: loop body
LE: loop exit
PB: predicated region body
PF: predicated region fallthrough
CT: control target
= control target key end

     0   :  { %8 = vsyncpa [#allocation3], 0  ;;  %s1706_s0 = inlined_call_operand.hbm [shape: f32[2,4,8,8], index: 0, kind: input, shape index: {}]   ;;  %s1707_s1 = inlined_call_operand.hbm [shape: bf16[4,8,24], index: 1, kind: input, shape index: {}]   ;;  %s1708_s2 = inlined_call_operand.hbm [shape: f32[4,1,24], index: 2, kind: input, shape index: {}]   ;;  %s1709_s3 = inlined_call_operand.hbm [shape: f32[2,4,8,8], index: 3, kind: output, shape index: {}]  }
   0x1   :  { %10 = vsyncpa [#allocation3 + $0x1], 0 }
   0x2   :  { %11 = vsyncpa [#allocation6], 0 }
   0x3   :  { %12 = vsyncpa [#allocation4], 0 }
   0x4   :  { %14 = vsyncpa [#allocation4 + $0x1], 0  ;;  %s1412_s12 = smov 0   ;;  %s1414_s13 = smov 0  }
   0x5   :  { %s1416_s14 = smov 0   ;;  %s1418_s15 = smov 0  }
   0x6 LB: > { %s1433_s16 = sadd.s32 4294967295, %s1374_s15   ;;  %s999_s17 = sadd.s32 4294967294, %s1374_s15   ;;  %s1374_s15 = sphi %s1418_s15, %s1731_s15   ;;  %s1370_s14 = sphi %s1416_s14, %s1730_s14   ;;  %s1366_s13 = sphi %s1414_s13, %s1729_s13   ;;  %s1362_s12 = sphi %s1412_s12, %s1728_s12  }
   0x7   : > { %p40_p0 = scmp.ne.s32.totalorder %s1366_s13, %s1362_s12  ;;  %p1710_p1 = scmp.eq.s32.totalorder %s1433_s16, 0 }
   0x8   : > { %p112_p3 = scmp.eq.s32.totalorder %s999_s17, 1  ;;  %p1000_p5 = scmp.ge.s32.totalorder %s1374_s15, 1 }
   0x9   : > { %p1442_p4 = por %p1710_p1, %p40_p0  ;;  %p119_p7 = scmp.lt.s32.totalorder %s1374_s15, 3 }
   0xa   : > { %p1447_p6 = por %p112_p3, %p40_p0  ;;  %s1376_s21 = smov [#allocation5]  }
   0xb   : > { %s1714_s18 = scalar_select %p1442_p4, 1, 0 }
   0xc   : > { %s1715_s19 = scalar_select %p1447_p6, 1, 0 }
   0xd   : > { %p1452_p8 = pnand %p1000_p5, %p119_p7  ;;  %s131_s22 = sshll.u32 %s1376_s21, 4  ;;  %s132_s22 = int_to_ptr.vmem [resolvable:$true] %s131_s22 }
   0xe   : > { %s1377_s24 = smov [#allocation7]   ;;  %s1237_s26 = scalar_lea.vmem %s132_s22, 256 }
   0xf   : > { %s1716_s20 = scalar_select %p1452_p8, 1, 0 }
  0x10   : > { %p1143_p9 = pneg %p1452_p8  ;;  %s144_s25 = sshll.u32 %s1377_s24, 4  ;;  %s145_s25 = int_to_ptr.vmem [resolvable:$true] %s144_s25 }
  0x11   : > { %p1238_p13 = scmp.ne.s32.totalorder %s132_s22, %s1237_s26  ;;  %p1245_p5 = scmp.lt.s32.totalorder %s132_s22, %s132_s22 }
  0x12   : > { %p1461_p11 = pnand %p1143_p9, %p1710_p1  ;;  %p1246_p7 = scmp.lt.s32.totalorder %s1237_s26, %s1237_s26 }
  0x14   : > { %p1228_p12 = pneg %p1461_p11  ;;  %p1247_p10 = por %p1246_p7, %p1245_p5 }
  0x16   : > { %p1240_p0 = pnand %p1238_p13, %p1228_p12 }
  0x18   : > { %p1241_p3 = pneg %p1240_p0 }
  0x1a   : > { %p1248_p9 = pnand %p1247_p10, %p1241_p3 }
  0x1c   : > { %1251 = shalt.err (!%p1248_p9)
}
  0x1d   : > { %s1378_s27 = smov 64   ;;  %s1379_s28 = smov 4  }
  0x1e   : > { %1146 = dma.hbm_to_vmem [thread:$0]  (!%p1461_p11), %s1707_s1, 256, %s132_s22, [#allocation6], %s1378_s27, %s1378_s27, %s1379_s28  }
  0x1f   : > { %s1263_s4 = scalar_lea.vmem %s145_s25, 64  ;;  %p1271_p2 = scmp.lt.s32.totalorder %s145_s25, %s145_s25 }
  0x20   : > { %p1264_p1 = scmp.ne.s32.totalorder %s145_s25, %s1263_s4  ;;  %p1272_p6 = scmp.lt.s32.totalorder %s1263_s4, %s1263_s4 }
  0x22   : > { %p1266_p13 = pnand %p1264_p1, %p1228_p12  ;;  %p1273_p5 = por %p1272_p6, %p1271_p2 }
  0x24   : > { %p1267_p0 = pneg %p1266_p13 }
  0x26   : > { %p1274_p10 = pnand %p1273_p5, %p1267_p0 }
  0x28   : > { %1277 = shalt.err (!%p1274_p10)
}
  0x29   : > { %s1380_s5 = smov 16   ;;  %s1381_s6 = smov 1  }
  0x2a   : > { %1149 = dma.hbm_to_vmem [thread:$0]  (!%p1461_p11), %s1708_s2, 64, %s145_s25, [#allocation6], %s1380_s5, %s1380_s5, %s1381_s6  }
  0x2b   : > { %s1484_s9 = sadd.s32 1, %s1374_s15   ;;  %s27_s11 = sadd.s32 1, %s1370_s14 }
  0x2c   : > { %s24_s10 = ssub.s32 %s1374_s15, %s1484_s9  ;;  %p34_p2 = scmp.ne.s32.totalorder %s1370_s14, %s1366_s13 }
  0x2d   : > { %p25_p1 = scmp.eq.s32.totalorder %s24_s10, 0  ;;  %p35_p6 = scmp.eq.s32.totalorder %s1374_s15, 0 }
  0x2e   : > { %p1718_p3 = scmp.eq.s32.totalorder %s1433_s16, 1  ;;  %p1160_p9 = scmp.lt.s32.totalorder %s1374_s15, 2 }
  0x2f   : > { %s1493_s17 = scalar_select %p25_p1, %s1370_s14, %s27_s11  }
  0x30   : > { %p36_p12 = por %p35_p6, %p34_p2  ;;  %p1497_p7 = por %p1718_p3, %p34_p2 }
  0x31   : > { %s158_s22 = sand.u32 1, %s1370_s14   ;;  %s1033_s24 = sshll.u32 %s1374_s15, 9 }
  0x32   : > { %s1719_s21 = scalar_select %p1497_p7, 1, 0 }
  0x33   : > { %s1004_s23 = sshll.u32 %s158_s22, 5  ;;  %s1507_s27 = scalar_lea.hbm %s1706_s0, %s1033_s24 }
  0x34   : > { %s162_s28 = scalar_lea.vmem [#allocation2], %s1004_s23  ;;  %p1511_p11 = pnand %p1160_p9, %p36_p12 }
  0x35   : > { %s169_s29 = sshll.u32 %s162_s28, 4  ;;  %s1515_s4 = scalar_lea.sflag [#allocation3], %s158_s22  ;;  %s1509_s29 = int_to_ptr.vmem [resolvable:$true] %s169_s29 }
  0x36   : > { %s1278_s5 = scalar_lea.hbm %s1507_s27, 512  ;;  %p1280_p0 = pneg %p1511_p11 }
  0x37   : > { %p1279_p13 = scmp.ne.s32.totalorder %s1507_s27, %s1278_s5  ;;  %s1283_s8 = scalar_lea.hbm %s1706_s0, 1024 }
  0x38   : > { %p1284_p1 = scmp.lt.s32.totalorder %s1507_s27, %s1706_s0  ;;  %p1285_p2 = scmp.lt.s32.totalorder %s1283_s8, %s1278_s5 }
  0x39   : > { %p1281_p5 = pnand %p1280_p0, %p1279_p13 }
  0x3a   : > { %p1286_p6 = por %p1285_p2, %p1284_p1 }
  0x3b   : > { %p1282_p10 = pneg %p1281_p5 }
  0x3d   : > { %p1287_p12 = pnand %p1286_p6, %p1282_p10 }
  0x3f   : > { %1290 = shalt.err (!%p1287_p12)
}
  0x40   : > { %s1291_s22 = scalar_lea.vmem %s1509_s29, 512  ;;  %s1382_s23 = smov [#allocation2]  }
  0x41   : > { %p1292_p3 = scmp.ne.s32.totalorder %s1509_s29, %s1291_s22  ;;  %s1296_s24 = sshll.u32 %s1382_s23, 4  ;;  %s1297_s24 = int_to_ptr.vmem [resolvable:$false] %s1296_s24 }
  0x42   : > { %s1298_s25 = scalar_lea.vmem %s1297_s24, 1024  ;;  %p1299_p5 = scmp.lt.s32.totalorder %s1509_s29, %s1297_s24 }
  0x43   : > { %p1294_p9 = pnand %p1292_p3, %p1280_p0  ;;  %p1300_p7 = scmp.lt.s32.totalorder %s1298_s25, %s1291_s22 }
  0x45   : > { %p1295_p13 = pneg %p1294_p9  ;;  %p1301_p4 = por %p1300_p7, %p1299_p5 }
  0x47   : > { %p1302_p8 = pnand %p1301_p4, %p1295_p13 }
  0x49   : > { %1305 = shalt.err (!%p1302_p8)
}
  0x4a   : > { %s1383_s26 = smov 128   ;;  %s1384_s28 = smov 8  }
  0x4b   : > { %1153 = dma.hbm_to_vmem [thread:$0]  (!%p1511_p11), %s1507_s27, 512, %s1509_s29, %s1515_s4, %s1383_s26, %s1383_s26, %s1384_s28  }
  0x4c   : > { %p1721_p0 = scmp.ne.s32.totalorder %s1716_s20, 0 }
  0x4d   : > { %s1539_s5 = sand.u32 (!%p1721_p0), 1, %s1366_s13   ;;  %p1722_p4 = scmp.ne.s32.totalorder (!%p1721_p0), %s1714_s18, 0 }
  0x4e   : > { %181 = sbr.rel (%p1721_p0) target bundleno = 1143 (0x477), region = 32  ;;  %s1008_s6 = sshll.u32 (!%p1721_p0), %s1539_s5, 5 }
  0x4f   : > { %s184_s7 = scalar_lea.sflag (!%p1721_p0), [#allocation3], %s1539_s5  ;;  %s1545_s8 = scalar_lea.vmem (!%p1721_p0), [#allocation2], %s1008_s6 }
  0x53   : > { %1349 = dma.done.wait (%p1722_p4), %s184_s7, 512  }
  0x54   : > { %1351 = vsyncadd (%p1722_p4), %s184_s7, 4294966784  ;;  %p1723_p8 = scmp.eq.s32.totalorder %s1433_s16, 0 }
  0x56   : > { %1353 = dma.done.wait (%p1723_p8), [#allocation6], 320   ;;  %p1724_p7 = pmov %p1723_p8 }
  0x57   : > { %v1385_v0 = vmov 0.0   ;;  %vm1386_vm0 = vmmov 0   ;;  %vm263_vm1 = vcmask 1043456   ;;  %v227_v1 = vld [vmem:[#allocation5] sm:$0xf]  ;;  %v220_v7 = vld [vmem:[%s1545_s8 + $0x8] sm:$0xff] }
  0x58   : > { %1355 = vsyncadd (%p1724_p7), [#allocation6], 4294966976  ;;  %1059 = vmatprep.subr.bf16.mxu0 %v1385_v0  ;;  %1065 = vmatprep.subr.bf16.mxu1 %v1385_v0  ;;  %v228_v2 = vld [vmem:[#allocation5 + $0x4] sm:$0xf]  ;;  %v265_v4 = vsel %vm263_vm1, %v227_v1, 0  ;;  %vm259_vm2 = vcmask 64512   ;;  %v224_v9 = vpack.c.bf16 %v220_v7, %v220_v7 }
  0x59   : > { %1061 = vmatprep.mubr.msk.bf16.mxu0 %vm1386_vm0, %v1385_v0  ;;  %1067 = vmatprep.mubr.msk.bf16.mxu1 %vm1386_vm0, %v1385_v0  ;;  %v219_v3 = vld [vmem:[%s1545_s8] sm:$0xff]  ;;  %v311_v5 = vsel %vm263_vm1, %v228_v2, 0  ;;  %v229_v8 = vld [vmem:[#allocation5 + $0x8] sm:$0xf]  ;;  %v230_v10 = vld [vmem:[#allocation5 + $0xc] sm:$0xf] }
  0x5a   : > { %v223_v6 = vpack.c.bf16 %v219_v3, %v219_v3  ;;  %1060 = vmatpush3.bf16.msra.mxu0 %v265_v4  ;;  %1066 = vmatpush3.bf16.msra.mxu1 %v311_v5  ;;  %v357_v11 = vsel %vm263_vm1, %v229_v8, 0  ;;  %v403_v12 = vsel %vm263_vm1, %v230_v10, 0  ;;  %v221_v13 = vld [vmem:[%s1545_s8 + $0x10] sm:$0xff]  ;;  %v222_v14 = vld [vmem:[%s1545_s8 + $0x18] sm:$0xff]  ;;  %s1387_s18 = smov 120   ;;  %s1388_s20 = smov 112  }
  0x5b   : > { %1071 = vmatprep.subr.bf16.mxu0 %v1385_v0  ;;  %1077 = vmatprep.subr.bf16.mxu1 %v1385_v0  ;;  %v225_v15 = vpack.c.bf16 %v221_v13, %v221_v13  ;;  %v226_v16 = vpack.c.bf16 %v222_v14, %v222_v14  ;;  %v1012_v17 = vld [vmem:[#allocation7] ss:$0 sm:$0xff]  ;;  %v1013_v18 = vld [vmem:[#allocation7 + $0x1] ss:$0 sm:$0xff]  ;;  %v1014_v31 = vld [vmem:[#allocation7 + $0x2] ss:$0 sm:$0xff] }
  0x5c   : > { %v1015_v32 = vld [vmem:[#allocation7 + $0x3] ss:$0 sm:$0xff]  ;;  %s217_s27 = scalar_lea.vmem [#allocation8], %s1008_s6  ;;  %s1034_s30 = sshll.u32 %s1433_s16, 9 }
  0x5d   : > { %1062 = vmatmul.mubr.msk.bf16.vlgmr.msra.gmra.mxu0 %vm259_vm2, %v223_v6  ;;  %1068 = vmatmul.mubr.msk.bf16.vlgmr.msra.gmra.mxu1 %vm259_vm2, %v224_v9  ;;  %s907_s29 = sshll.u32 %s217_s27, 4  ;;  %s1662_s11 = scalar_lea.hbm %s1709_s3, %s1034_s30  ;;  %s1656_s29 = int_to_ptr.vmem [resolvable:$true] %s907_s29 }
  0x5e   : > { %1072 = vmatpush3.bf16.msra.mxu0 %v357_v11  ;;  %1078 = vmatpush3.bf16.msra.mxu1 %v403_v12  ;;  %s894_s16 = scalar_lea.sflag [#allocation4], %s1539_s5  ;;  %s1306_s22 = scalar_lea.vmem %s1656_s29, 512 }
  0x5f   : > { %1073 = vmatprep.mubr.msk.bf16.mxu0 %vm1386_vm0, %v1385_v0  ;;  %1079 = vmatprep.mubr.msk.bf16.mxu1 %vm1386_vm0, %v1385_v0  ;;  %p1307_p11 = scmp.ne.s32.totalorder %s1656_s29, %s1306_s22  ;;  %p1725_p10 = scmp.ne.s32.totalorder %s1719_s21, 0 }
  0x60   : > { %1083 = vmatprep.subr.bf16.mxu0 %v1385_v0  ;;  %1089 = vmatprep.subr.bf16.mxu1 %v1385_v0  ;;  %s1389_s23 = smov [#allocation8]  }
  0x61   : > { %p1308_p1 = pnand %p1307_p11, %p1725_p10  ;;  %s1310_s24 = sshll.u32 %s1389_s23, 4  ;;  %s1311_s24 = int_to_ptr.vmem [resolvable:$false] %s1310_s24 }
  0x62   : > { %s1312_s25 = scalar_lea.vmem %s1311_s24, 1024  ;;  %p1313_p6 = scmp.lt.s32.totalorder %s1656_s29, %s1311_s24 }
  0x63   : > { %p1309_p2 = pneg %p1308_p1  ;;  %p1314_p12 = scmp.lt.s32.totalorder %s1312_s25, %s1306_s22 }
  0x65   : > { %1074 = vmatmul.mubr.msk.bf16.vlgmr.msra.gmra.mxu0 %vm259_vm2, %v225_v15  ;;  %1080 = vmatmul.mubr.msk.bf16.vlgmr.msra.gmra.mxu1 %vm259_vm2, %v226_v16  ;;  %p1315_p3 = por %p1314_p12, %p1313_p6 }
  0x66   : > { %1085 = vmatprep.mubr.msk.bf16.mxu0 %vm1386_vm0, %v1385_v0  ;;  %1091 = vmatprep.mubr.msk.bf16.mxu1 %vm1386_vm0, %v1385_v0 }
  0x67   : > { %p1316_p9 = pnand %p1315_p3, %p1309_p2 }
 0x11d   : > { %v301_v19 = vpop.f32.mrf.mxu0  ;;  %v347_v20 = vpop.f32.mrf.mxu1 }
 0x11e   : > { %v302_v21 = vadd.f32 %v1012_v17, %v301_v19  ;;  %v348_v22 = vadd.f32 %v1013_v18, %v347_v20 }
 0x11f   : > { %v1063_v23 = vpop.f32.mrf.mxu0  ;;  %v1069_v24 = vpop.f32.mrf.mxu1 }
 0x120   : > { %v1585_v25 = vpack.c.bf16 %v302_v21, %v302_v21  ;;  %v1587_v28 = vpack.c.bf16 %v348_v22, %v348_v22 }
 0x121   : > { %v304_v26 = vpop.f32.mrf.mxu0  ;;  %v350_v27 = vpop.f32.mrf.mxu1 }
 0x122   : > { %450 = vrot.lane.b32.xlu0 %v1585_v25, %s1387_s18 }
 0x123   : > { %v1064_v29 = vpop.f32.mrf.mxu0  ;;  %v1070_v30 = vpop.f32.mrf.mxu1 }
 0x125   : > { %v393_v33 = vpop.f32.mrf.mxu0  ;;  %v439_v34 = vpop.f32.mrf.mxu1 }
 0x126   : > { %v394_v35 = vadd.f32 %v1014_v31, %v393_v33  ;;  %v440_v36 = vadd.f32 %v1015_v32, %v439_v34  ;;  %499 = vrot.lane.b32.xlu0 %v1587_v28, %s1387_s18 }
 0x127   : > { %v1075_v37 = vpop.f32.mrf.mxu0  ;;  %v1081_v38 = vpop.f32.mrf.mxu1 }
 0x128   : > { %v1591_v39 = vpack.c.bf16 %v394_v35, %v394_v35  ;;  %v1593_v42 = vpack.c.bf16 %v440_v36, %v440_v36 }
 0x129   : > { %v396_v40 = vpop.f32.mrf.mxu0  ;;  %v442_v41 = vpop.f32.mrf.mxu1 }
 0x12a   : > { %548 = vrot.lane.b32.xlu1 %v1591_v39, %s1387_s18 }
 0x12b   : > { %v1076_v43 = vpop.f32.mrf.mxu0  ;;  %v1082_v44 = vpop.f32.mrf.mxu1 }
 0x12e   : > { %597 = vrot.lane.b32.xlu1 %v1593_v42, %s1387_s18 }
 0x194   : > { %v451_v45 = vpop.permute.xlu0 %450 }
 0x195   : > { %v456_v46 = vsel %vm259_vm2, %v451_v45, 0 }
 0x196   : > { %1084 = vmatpush3.bf16.xpose.msra.mxu0 %v456_v46 }
 0x197   : > { %1095 = vmatprep.subr.bf16.mxu0 %v1385_v0 }
 0x198   : > { %v500_v47 = vpop.permute.xlu0 %499 }
 0x199   : > { %v505_v48 = vsel %vm259_vm2, %v500_v47, 0 }
 0x19a   : > { %1090 = vmatpush3.bf16.xpose.msra.mxu1 %v505_v48 }
 0x19b   : > { %1101 = vmatprep.subr.bf16.mxu1 %v1385_v0 }
 0x19c   : > { %v549_v49 = vpop.permute.xlu1 %548 }
 0x19d   : > { %v554_v50 = vsel %vm259_vm2, %v549_v49, 0  ;;  %1086 = vmatmul.mubr.msk.bf16.vlgmr.msra.gmra.mxu0 %vm259_vm2, %v1585_v25 }
 0x19e   : > { %1096 = vmatpush3.bf16.xpose.msra.mxu0 %v554_v50  ;;  %1097 = vmatprep.mubr.msk.bf16.mxu0 %vm1386_vm0, %v1385_v0 }
 0x19f   : > { %1107 = vmatprep.subr.bf16.mxu0 %v1385_v0 }
 0x1a0   : > { %v598_v51 = vpop.permute.xlu1 %597 }
 0x1a1   : > { %v603_v52 = vsel %vm259_vm2, %v598_v51, 0  ;;  %1092 = vmatmul.mubr.msk.bf16.vlgmr.msra.gmra.mxu1 %vm259_vm2, %v1587_v28 }
 0x1a2   : > { %1102 = vmatpush3.bf16.xpose.msra.mxu1 %v603_v52  ;;  %1103 = vmatprep.mubr.msk.bf16.mxu1 %vm1386_vm0, %v1385_v0 }
 0x1a3   : > { %1113 = vmatprep.subr.bf16.mxu1 %v1385_v0 }
 0x1a5   : > { %1098 = vmatmul.mubr.msk.bf16.vlgmr.msra.gmra.mxu0 %vm259_vm2, %v1591_v39 }
 0x1a6   : > { %1109 = vmatprep.mubr.msk.bf16.mxu0 %vm1386_vm0, %v1385_v0 }
 0x1a9   : > { %1104 = vmatmul.mubr.msk.bf16.vlgmr.msra.gmra.mxu1 %vm259_vm2, %v1593_v42 }
 0x1aa   : > { %1115 = vmatprep.mubr.msk.bf16.mxu1 %vm1386_vm0, %v1385_v0 }
 0x25d   : > { %v492_v53 = vpop.f32.mrf.mxu0 }
 0x25e   : > { %v645_v54 = vmul.f32 0.35355338, %v492_v53 }
 0x25f   : > { %v1087_v55 = vpop.f32.mrf.mxu0 }
 0x260   : > { %v649_v56 = vsel %vm259_vm2, %v645_v54, -inf }
 0x261   : > { %v541_v57 = vpop.f32.mrf.mxu1  ;;  %650 = vmax.xlane.f32.xlu0 %v649_v56  ;;  %v495_v58 = vpop.f32.mrf.mxu0 }
 0x262   : > { %v646_v59 = vmul.f32 0.35355338, %v541_v57 }
 0x263   : > { %v1088_v60 = vpop.f32.mrf.mxu0  ;;  %v1093_v61 = vpop.f32.mrf.mxu1 }
 0x264   : > { %v652_v62 = vsel %vm259_vm2, %v646_v59, -inf }
 0x265   : > { %v544_v63 = vpop.f32.mrf.mxu1  ;;  %653 = vmax.xlane.f32.xlu1 %v652_v62  ;;  %v590_v1 = vpop.f32.mrf.mxu0 }
 0x266   : > { %v647_v2 = vmul.f32 0.35355338, %v590_v1 }
 0x267   : > { %v1094_v3 = vpop.f32.mrf.mxu1  ;;  %v1099_v4 = vpop.f32.mrf.mxu0 }
 0x268   : > { %v655_v5 = vsel %vm259_vm2, %v647_v2, -inf }
 0x269   : > { %v639_v6 = vpop.f32.mrf.mxu1  ;;  %656 = vmax.xlane.f32.xlu0 %v655_v5  ;;  %v593_v7 = vpop.f32.mrf.mxu0 }
 0x26a   : > { %v648_v8 = vmul.f32 0.35355338, %v639_v6 }
 0x26b   : > { %v1100_v9 = vpop.f32.mrf.mxu0  ;;  %v1105_v10 = vpop.f32.mrf.mxu1 }
 0x26c   : > { %v658_v11 = vsel %vm259_vm2, %v648_v8, -inf }
 0x26d   : > { %v642_v12 = vpop.f32.mrf.mxu1  ;;  %659 = vmax.xlane.f32.xlu0 %v658_v11 }
 0x26f   : > { %v1106_v13 = vpop.f32.mrf.mxu1 }
 0x276   : > { %697 = vrot.lane.b32.xlu1 %v1585_v25, %s1388_s20 }
 0x2ea   : > { %v651_v14 = vpop.xlane.xlu0 %650 }
 0x2eb   : > { %v661_v15 = vsub.f32 %v645_v54, %v651_v14 }
 0x2ed   : > { %v665_v16 = vmul.f32 1.442695, %v661_v15 }
 0x2ee   : > { %v654_v17 = vpop.xlane.xlu1 %653 }
 0x2ef   : > { %1210 = vpow2.f32 %v665_v16  ;;  %v662_v18 = vsub.f32 %v646_v59, %v654_v17 }
 0x2f1   : > { %v667_v19 = vmul.f32 1.442695, %v662_v18 }
 0x2f2   : > { %v698_v20 = vpop.permute.xlu1 %697  ;;  %v657_v21 = vpop.xlane.xlu0 %656 }
 0x2f3   : > { %1212 = vpow2.f32 %v667_v19  ;;  %v703_v22 = vsel %vm263_vm1, %v698_v20, 0  ;;  %v663_v23 = vsub.f32 %v647_v2, %v657_v21 }
 0x2f4   : > { %1108 = vmatpush3.bf16.msra.mxu0 %v703_v22 }
 0x2f5   : > { %v669_v24 = vmul.f32 1.442695, %v663_v23  ;;  %1119 = vmatprep.subr.bf16.mxu0 %v1385_v0 }
 0x2f6   : > { %v660_v26 = vpop.xlane.xlu0 %659 }
 0x2f7   : > { %1214 = vpow2.f32 %v669_v24  ;;  %v664_v25 = vsub.f32 %v648_v8, %v660_v26 }
 0x2f9   : > { %v671_v27 = vmul.f32 1.442695, %v664_v25 }
 0x2fb   : > { %1216 = vpow2.f32 %v671_v27 }
 0x2fc   : > { %v1211_v29 = vpop.eup %1210 }
 0x2fd   : > { %v673_v30 = vsel %vm259_vm2, %v1211_v29, 0.0 }
 0x2fe   : > { %674 = vadd.xlane.f32.xlu1 %v673_v30 }
 0x300   : > { %v1213_v31 = vpop.eup %1212 }
 0x301   : > { %v676_v32 = vsel %vm259_vm2, %v1213_v31, 0.0 }
 0x302   : > { %677 = vadd.xlane.f32.xlu0 %v676_v32 }
 0x304   : > { %v1215_v33 = vpop.eup %1214 }
 0x305   : > { %v679_v34 = vsel %vm259_vm2, %v1215_v33, 0.0 }
 0x306   : > { %680 = vadd.xlane.f32.xlu1 %v679_v34 }
 0x308   : > { %v1217_v35 = vpop.eup %1216 }
 0x309   : > { %v682_v36 = vsel %vm259_vm2, %v1217_v35, 0.0 }
 0x30a   : > { %683 = vadd.xlane.f32.xlu0 %v682_v36 }
 0x317   : > { %793 = vrot.lane.b32.xlu1 %v1591_v39, %s1388_s20 }
 0x31b   : > { %841 = vrot.lane.b32.xlu1 %v1593_v42, %s1388_s20 }
 0x320   : > { %745 = vrot.lane.b32.xlu0 %v1587_v28, %s1388_s20 }
 0x387   : > { %v675_v37 = vpop.xlane.xlu1 %674 }
 0x388   : > { %1218 = vrcp.f32 %v675_v37 }
 0x38b   : > { %v678_v38 = vpop.xlane.xlu0 %677 }
 0x38c   : > { %1220 = vrcp.f32 %v678_v38 }
 0x38f   : > { %v681_v40 = vpop.xlane.xlu1 %680 }
 0x390   : > { %1222 = vrcp.f32 %v681_v40 }
 0x393   : > { %v684_v41 = vpop.xlane.xlu0 %683  ;;  %v794_v44 = vpop.permute.xlu1 %793 }
 0x394   : > { %1224 = vrcp.f32 %v684_v41  ;;  %v799_v42 = vsel %vm263_vm1, %v794_v44, 0 }
 0x395   : > { %v1219_v43 = vpop.eup %1218 }
 0x396   : > { %v689_v45 = vmul.f32 %v1219_v43, %v1211_v29 }
 0x397   : > { %v746_v46 = vpop.permute.xlu0 %745  ;;  %v842_v49 = vpop.permute.xlu1 %841 }
 0x398   : > { %v751_v39 = vsel %vm263_vm1, %v746_v46, 0  ;;  %v693_v47 = vpack.c.bf16 %v689_v45, %v689_v45  ;;  %v847_v52 = vsel %vm263_vm1, %v842_v49, 0 }
 0x399   : > { %v1221_v48 = vpop.eup %1220  ;;  %1114 = vmatpush3.bf16.msra.mxu1 %v751_v39 }
 0x39a   : > { %1110 = vmatmul.mubr.msk.bf16.vlgmr.msra.gmra.mxu0 %vm259_vm2, %v693_v47  ;;  %1125 = vmatprep.subr.bf16.mxu1 %v1385_v0  ;;  %v690_v28 = vmul.f32 %v1221_v48, %v1213_v31 }
 0x39b   : > { %1120 = vmatpush3.bf16.msra.mxu0 %v799_v42  ;;  %1121 = vmatprep.mubr.msk.bf16.mxu0 %vm1386_vm0, %v1385_v0 }
 0x39c   : > { %v694_v50 = vpack.c.bf16 %v690_v28, %v690_v28 }
 0x39d   : > { %v1223_v51 = vpop.eup %1222 }
 0x39e   : > { %1116 = vmatmul.mubr.msk.bf16.vlgmr.msra.gmra.mxu1 %vm259_vm2, %v694_v50  ;;  %v691_v53 = vmul.f32 %v1223_v51, %v1215_v33 }
 0x39f   : > { %1126 = vmatpush3.bf16.msra.mxu1 %v847_v52  ;;  %1127 = vmatprep.mubr.msk.bf16.mxu1 %vm1386_vm0, %v1385_v0 }
 0x3a0   : > { %v695_v54 = vpack.c.bf16 %v691_v53, %v691_v53 }
 0x3a1   : > { %v1225_v55 = vpop.eup %1224 }
 0x3a2   : > { %1122 = vmatmul.mubr.msk.bf16.vlgmr.msra.gmra.mxu0 %vm259_vm2, %v695_v54  ;;  %v692_v56 = vmul.f32 %v1225_v55, %v1217_v35 }
 0x3a4   : > { %v696_v57 = vpack.c.bf16 %v692_v56, %v692_v56 }
 0x3a6   : > { %1128 = vmatmul.mubr.msk.bf16.vlgmr.msra.gmra.mxu1 %vm259_vm2, %v696_v57 }
 0x45a   : > { %v739_v58 = vpop.f32.mrf.mxu0 }
 0x45b   : > { %889 = vst.msk [vmem:[%s217_s27] sm:$0xff] %vm259_vm2, %v739_v58 }
 0x45c   : > { %v1111_v59 = vpop.f32.mrf.mxu0 }
 0x45e   : > { %v742_v60 = vpop.f32.mrf.mxu0  ;;  %v787_v61 = vpop.f32.mrf.mxu1 }
 0x45f   : > { %890 = vst.msk [vmem:[%s217_s27 + $0x8] sm:$0xff] %vm259_vm2, %v787_v61 }
 0x460   : > { %v1112_v0 = vpop.f32.mrf.mxu0  ;;  %v1117_v62 = vpop.f32.mrf.mxu1 }
 0x462   : > { %v790_v63 = vpop.f32.mrf.mxu1  ;;  %v835_v1 = vpop.f32.mrf.mxu0 }
 0x463   : > { %891 = vst.msk [vmem:[%s217_s27 + $0x10] sm:$0xff] %vm259_vm2, %v835_v1 }
 0x464   : > { %v1118_v2 = vpop.f32.mrf.mxu1  ;;  %v1123_v3 = vpop.f32.mrf.mxu0 }
 0x466   : > { %v838_v4 = vpop.f32.mrf.mxu0  ;;  %v883_v5 = vpop.f32.mrf.mxu1 }
 0x467   : > { %892 = vst.msk [vmem:[%s217_s27 + $0x18] sm:$0xff] %vm259_vm2, %v883_v5 }
 0x468   : > { %v1124_v6 = vpop.f32.mrf.mxu0  ;;  %v1129_v7 = vpop.f32.mrf.mxu1 }
 0x469   : > { %1319 = shalt.err (!%p1316_p9)
}
 0x46a   : > { %s1320_s26 = scalar_lea.hbm %s1662_s11, 512  ;;  %s1324_s7 = scalar_lea.hbm %s1709_s3, 1024 }
 0x46b   : > { %p1321_p13 = scmp.ne.s32.totalorder %s1662_s11, %s1320_s26  ;;  %p1325_p4 = scmp.lt.s32.totalorder %s1662_s11, %s1709_s3 }
 0x46c   : > { %p1326_p8 = scmp.lt.s32.totalorder %s1324_s7, %s1320_s26 }
 0x46d   : > { %p1322_p5 = pnand %p1321_p13, %p1725_p10 }
 0x46e   : > { %p1327_p7 = por %p1326_p8, %p1325_p4 }
 0x46f   : > { %p1323_p0 = pneg %p1322_p5 }
 0x471   : > { %p1328_p11 = pnand %p1327_p7, %p1323_p0 }
 0x473   : > { %1331 = shalt.err (!%p1328_p11)
}
 0x474   : > { %s1390_s20 = smov 128   ;;  %s1391_s27 = smov 8   ;;  %v886_v8 = vpop.f32.mrf.mxu1 }
 0x475   : > { %1141 = dma.vmem_to_hbm [thread:$0]  (%p1725_p10), %s1656_s29, 512, %s1662_s11, %s894_s16, %s1390_s20, %s1390_s20, %s1391_s27  }
 0x476   : > { %v1130_v9 = vpop.f32.mrf.mxu1 }
 0x477 PF: > { %s922_s30 = sand.u32 1, %s1362_s12   ;;  %p1726_p1 = scmp.ne.s32.totalorder %s1715_s19, 0 }
 0x478   : > { %p1727_p2 = scmp.ge.s32.totalorder %s1374_s15, 2  ;;  %s923_s4 = scalar_lea.sflag [#allocation4], %s922_s30 }
 0x47a   : > { %p1155_p6 = pnand %p1727_p2, %p1726_p1 }
 0x47c   : > { %p1156_p12 = pneg %p1155_p6 }
 0x47e   : > { %1357 = dma.done.wait (%p1156_p12), %s923_s4, 512  }
 0x47f   : > { %1359 = vsyncadd (%p1156_p12), %s923_s4, 4294966784  ;;  %p17_p10 = scmp.ge.s32.totalorder %s1484_s9, 4   ;;  %s1728_s12 = smov %s1366_s13 }
 0x480   : > { %s1729_s13 = smov %s1370_s14  ;;  %s1730_s14 = smov %s1493_s17 }
 0x481   : > { %s1731_s15 = smov %s1484_s9  ;;  %19 = sbr.rel (!%p17_p10) target bundleno = 6 (0x6), region = 85 }
 0x486   :  { %928 = vsyncpa [#allocation3], 1 }
 0x487   :  { %930 = vsyncpa [#allocation3 + $0x1], 1 }
 0x488   :  { %931 = vsyncpa [#allocation6], 1 }
 0x489   :  { %932 = vsyncpa [#allocation4], 1 }
 0x48a   :  { %934 = vsyncpa [#allocation4 + $0x1], 1 }

</bundles_post_ra>
